<compile_context>
chip_gen: v5e
topology: v5e:2x2
jax: 0.10.0
libtpu: 0.0.40
codegen_flags: <defaults>
</compile_context>

<pallas_src>
import jax
import jax.numpy as jnp
from jax import lax
from jax.experimental import pallas as pl
from jax.experimental.pallas import tpu as pltpu


def make_params(key, inp, oup, expand_ratio):
    """Deterministic synthetic parameters with PyTorch-layout shapes."""
    chid = inp * expand_ratio
    ks = jax.random.split(key, 6)
    w1 = jax.random.normal(ks[0], (chid, inp, 1, 1), jnp.float32) * 0.2   # 1x1 expand
    wd = jax.random.normal(ks[1], (chid, 1, 3, 3), jnp.float32) * 0.2     # 3x3 depthwise
    w2 = jax.random.normal(ks[2], (oup, chid, 1, 1), jnp.float32) * 0.2   # 1x1 project

    def bn(k, c):
        k1, k2, k3, k4 = jax.random.split(k, 4)
        gamma = jax.random.uniform(k1, (c,), jnp.float32, 0.5, 1.5)
        beta = jax.random.normal(k2, (c,), jnp.float32) * 0.1
        mean = jax.random.normal(k3, (c,), jnp.float32) * 0.1
        var = jax.random.uniform(k4, (c,), jnp.float32, 0.5, 1.5)
        return (gamma, beta, mean, var)

    return dict(w1=w1, wd=wd, w2=w2,
                bn1=bn(ks[3], chid), bn2=bn(ks[4], chid), bn3=bn(ks[5], oup))


def _fold_bn_into_weight(w, gamma, beta, mean, var, eps):
    """Fold inference-mode BN (per output channel) into a (Cout, K) weight."""
    scale = gamma / jnp.sqrt(var + eps)
    return w * scale[:, None], (beta - mean * scale)[:, None]   # (Cout,K), (Cout,1)


def _pick_batch_block(N, Cin, Chid, Cout, HW, HWo, cap=8, vmem_budget=12 << 20):
    """Largest Nb (images per grid step) that divides N, keeps >=2 grid steps
    when N > 1 (v7x has 2 TensorCores), and respects a VMEM working-set budget
    (v5e scoped default is 16 MiB; v7x physical VMEM is 64 MiB)."""
    def working_set(nb):
        L = nb * HW
        io = 2 * 4 * (Cin * L + Cout * nb * HWo)        # double-buffered in/out blocks
        live = 4 * L * (Cin + 4 * Chid + Cout)          # xb, y, tap, acc/z, out (f32)
        return io + live

    best = 1
    for nb in range(1, min(N, cap) + 1):
        if N % nb:
            continue
        if N > 1 and N // nb < 2:          # keep both v7x TensorCores busy
            continue
        if working_set(nb) > vmem_budget:
            continue
        best = nb
    return best


def _make_kernel(H, W, HW, HWo, Nb, Chid, stride, use_res):
    """Kernel over one batch block of Nb images, flattened spatial on lanes."""
    L = Nb * HW
    w_pow2 = (W & (W - 1)) == 0
    h_pow2 = (H & (H - 1)) == 0
    w_shift = W.bit_length() - 1

    def kernel(*refs):
        if stride == 1:
            (x_ref, w1_ref, b1_ref, wd_ref, b2_ref,
             w2_ref, b3_ref, o_ref) = refs
            sel_ref = None
        else:
            (x_ref, sel_ref, w1_ref, b1_ref, wd_ref, b2_ref,
             w2_ref, b3_ref, o_ref) = refs

        # ---- gather the Nb images into one lane-dense (Cin, Nb*HW) slab ----
        # (each image is a 128-aligned 256-lane sub-slab, so the concat is an
        # aligned lane-copy; it lets every op below see a wide RHS.)
        if Nb == 1:
            xb = x_ref[0]
        else:
            xb = jnp.concatenate([x_ref[b] for b in range(Nb)], axis=-1)
        xb = xb.astype(jnp.float32)                                  # (Cin, L)

        # ---- 1x1 expansion + BN1 + ReLU6 (BN1 scale folded into w1) ----
        y = jnp.dot(w1_ref[...], xb, preferred_element_type=jnp.float32)
        y = jnp.clip(y + b1_ref[...], 0.0, 6.0)                      # (Chid, L)

        # ---- border masks, hoisted out of the 9-tap loop ----
        idx = lax.broadcasted_iota(jnp.int32, (Chid, L), 1)
        if w_pow2:
            col = jnp.bitwise_and(idx, W - 1)
            rowq = jnp.right_shift(idx, w_shift)
        else:
            col = idx % W
            rowq = idx // W
        row = jnp.bitwise_and(rowq, H - 1) if h_pow2 else rowq % H
        not_left = col > 0            # tap dw=-1 invalid at output column 0
        not_right = col < (W - 1)     # tap dw=+1 invalid at output column W-1
        not_top = row > 0             # tap dh=-1 invalid at output row 0
        not_bot = row < (H - 1)       # tap dh=+1 invalid at output row H-1

        # ---- 3x3 depthwise conv, padding=1 (stride handled below) ----
        # Each tap is an XLU roll of the whole slab; out-of-frame / cross-image
        # wrap-around lands only at positions the masks zero out.
        wdv = wd_ref[...]                                            # (Chid, 9), BN2 folded
        acc = jnp.broadcast_to(b2_ref[...], (Chid, L))               # init with BN2 bias
        for kh in range(3):
            for kw in range(3):
                d = (kh - 1) * W + (kw - 1)
                tap = y if d == 0 else pltpu.roll(y, shift=(-d) % L, axis=1)
                if kh == 0:
                    tap = jnp.where(not_top, tap, 0.0)
                elif kh == 2:
                    tap = jnp.where(not_bot, tap, 0.0)
                if kw == 0:
                    tap = jnp.where(not_left, tap, 0.0)
                elif kw == 2:
                    tap = jnp.where(not_right, tap, 0.0)
                k = kh * 3 + kw
                acc = acc + tap * wdv[:, k:k + 1]
        z = jnp.clip(acc, 0.0, 6.0)                                  # (Chid, L)

        # ---- 1x1 projection + BN3 (+ residual); stride>1 decimates first ----
        if stride == 1:
            out = jnp.dot(w2_ref[...], z, preferred_element_type=jnp.float32)
            out = out + b3_ref[...]                                  # (Cout, L)
            if use_res:
                out = out + xb
            for b in range(Nb):                                      # aligned 256-lane stores
                o_ref[b] = out[:, b * HW:(b + 1) * HW].astype(o_ref.dtype)
        else:
            # Per-image 0/1 selection matmul compacts z to the strided output
            # grid before the projection -> stride^2 less projection work and
            # stride^2 fewer output bytes written to HBM.
            sel = sel_ref[...]                                       # (HW, HWo)
            w2 = w2_ref[...]
            b3 = b3_ref[...]
            for b in range(Nb):
                zb = z[:, b * HW:(b + 1) * HW]                       # 128-aligned slab
                z_dec = jnp.dot(zb, sel, preferred_element_type=jnp.float32)   # (Chid, HWo)
                ob = jnp.dot(w2, z_dec, preferred_element_type=jnp.float32) + b3
                o_ref[b] = ob.astype(o_ref.dtype)

    return kernel


def inverted_residual_bottleneck(x_nchw, params, *, stride=1, eps=1e-5,
                                 batch_block=None):
    """NCHW-in / NCHW-out forward matching the PyTorch module (inference BN)."""
    N, Cin, H, W = x_nchw.shape
    Chid = params["w1"].shape[0]
    Cout = params["w2"].shape[0]
    HW = H * W
    Ho = (H - 1) // stride + 1          # conv k=3, pad=1, stride s
    Wo = (W - 1) // stride + 1
    HWo = Ho * Wo
    use_res = (stride == 1 and Cin == Cout)

    # Fold BN scales into the conv weights outside the kernel.
    w1s, b1 = _fold_bn_into_weight(params["w1"][:, :, 0, 0], *params["bn1"], eps)
    wds, b2 = _fold_bn_into_weight(params["wd"].reshape(Chid, 9), *params["bn2"], eps)
    w2s, b3 = _fold_bn_into_weight(params["w2"][:, :, 0, 0], *params["bn3"], eps)

    x_flat = x_nchw.reshape(N, Cin, HW)   # channels on sublanes, spatial on lanes

    Nb = batch_block if batch_block is not None else _pick_batch_block(
        N, Cin, Chid, Cout, HW, HWo)
    assert N % Nb == 0, (N, Nb)

    in_specs = [pl.BlockSpec((Nb, Cin, HW), lambda n: (n, 0, 0))]     # x batch block
    args = [x_flat]
    if stride > 1:
        # 0/1 selection matrix mapping the full-res flat index to the strided
        # output grid (exact: each output column sums exactly one z value).
        src = (jnp.arange(Ho)[:, None] * (stride * W)
               + jnp.arange(Wo)[None, :] * stride).reshape(-1)        # (HWo,)
        sel = (jnp.arange(HW)[:, None] == src[None, :]).astype(jnp.float32)
        in_specs.append(pl.BlockSpec((HW, HWo), lambda n: (0, 0)))
        args.append(sel)
    in_specs += [
        pl.BlockSpec((Chid, Cin), lambda n: (0, 0)),    # w1 (BN1 scale folded)
        pl.BlockSpec((Chid, 1), lambda n: (0, 0)),      # b1
        pl.BlockSpec((Chid, 9), lambda n: (0, 0)),      # depthwise w (BN2 folded)
        pl.BlockSpec((Chid, 1), lambda n: (0, 0)),      # b2
        pl.BlockSpec((Cout, Chid), lambda n: (0, 0)),   # w2 (BN3 scale folded)
        pl.BlockSpec((Cout, 1), lambda n: (0, 0)),      # b3
    ]
    args += [w1s, b1, wds, b2, w2s, b3]

    grid_spec = pltpu.PrefetchScalarGridSpec(
        num_scalar_prefetch=0,
        grid=(N // Nb,),
        in_specs=in_specs,
        out_specs=pl.BlockSpec((Nb, Cout, HWo), lambda n: (n, 0, 0)),
    )

    out_flat = pl.pallas_call(
        _make_kernel(H, W, HW, HWo, Nb, Chid, stride, use_res),
        out_shape=jax.ShapeDtypeStruct((N, Cout, HWo), x_nchw.dtype),
        grid_spec=grid_spec,
        compiler_params=pltpu.CompilerParams(
            dimension_semantics=("parallel",),          # batch blocks independent
            vmem_limit_bytes=32 * 1024 * 1024),         # above v5e's 16 MiB scoped default
    )(*args)

    return out_flat.reshape(N, Cout, Ho, Wo)


def reference_nchw(x, params, stride, eps=1e-5):
    """Independent pure-JAX reference (lax.conv_general_dilated, NCHW)."""
    def bn(v, stats):
        gamma, beta, mean, var = stats
        s = gamma / jnp.sqrt(var + eps)
        return v * s[None, :, None, None] + (beta - mean * s)[None, :, None, None]

    dn = ("NCHW", "OIHW", "NCHW")
    chid = params["w1"].shape[0]
    y = lax.conv_general_dilated(x, params["w1"], (1, 1), "VALID",
                                 dimension_numbers=dn)
    y = jnp.clip(bn(y, params["bn1"]), 0.0, 6.0)
    y = lax.conv_general_dilated(y, params["wd"], (stride, stride),
                                 ((1, 1), (1, 1)), dimension_numbers=dn,
                                 feature_group_count=chid)
    y = jnp.clip(bn(y, params["bn2"]), 0.0, 6.0)
    y = lax.conv_general_dilated(y, params["w2"], (1, 1), "VALID",
                                 dimension_numbers=dn)
    y = bn(y, params["bn3"])
    if stride == 1 and x.shape[1] == y.shape[1]:
        y = y + x
    return y


if __name__ == "__main__":
    key = jax.random.PRNGKey(0)
    k1, k2, k3, k4 = jax.random.split(key, 4)
    H, W = 16, 16

    # Case 1: N=2, stride=1, inp == oup -> residual connection used.
    # Auto batch block keeps grid=(2,) (>=2 parallel steps for v7x's 2 TCs).
    N1, inp, oup, stride, er = 2, 4, 4, 1, 6
    x = jax.random.normal(k1, (N1, inp, H, W), jnp.float32)
    params = make_params(k2, inp, oup, er)
    out = jax.block_until_ready(
        inverted_residual_bottleneck(x, params, stride=stride))
    ref = reference_nchw(x, params, stride)
    assert out.shape == ref.shape, (out.shape, ref.shape)
    assert jnp.allclose(out, ref, atol=1e-4, rtol=1e-4), (
        float(jnp.max(jnp.abs(out - ref))))

    # Case 2: N=4, stride=2, inp != oup -> no residual, in-kernel decimation.
    # Auto batch block picks Nb=2 (2 images per grid step, grid=(2,)).
    N2, inp2, oup2, stride2, er2 = 4, 4, 8, 2, 6
    x2 = jax.random.normal(k3, (N2, inp2, H, W), jnp.float32)
    params2 = make_params(k4, inp2, oup2, er2)
    out2 = jax.block_until_ready(
        inverted_residual_bottleneck(x2, params2, stride=stride2))
    ref2 = reference_nchw(x2, params2, stride2)
    assert out2.shape == ref2.shape, (out2.shape, ref2.shape)
    assert jnp.allclose(out2, ref2, atol=1e-4, rtol=1e-4), (
        float(jnp.max(jnp.abs(out2 - ref2))))

    print("KERNEL_OK")
</pallas_src>

<mosaic_0001>
module attributes {stable_mosaic.version = 11 : i64} {
  func.func @kernel(%arg0: i32, %arg1: memref<1x4x256xf32, #tpu.memory_space<vmem>>, %arg2: memref<24x4xf32, #tpu.memory_space<vmem>>, %arg3: memref<24x1xf32, #tpu.memory_space<vmem>>, %arg4: memref<24x9xf32, #tpu.memory_space<vmem>>, %arg5: memref<24x1xf32, #tpu.memory_space<vmem>>, %arg6: memref<4x24xf32, #tpu.memory_space<vmem>>, %arg7: memref<4x1xf32, #tpu.memory_space<vmem>>, %arg8: memref<1x4x256xf32, #tpu.memory_space<vmem>>) attributes {dimension_semantics = [#tpu.dimension_semantics<parallel>], iteration_bounds = array<i64: 2>, scalar_prefetch = 0 : i64, scratch_operands = 0 : i64, tpu.core_type = #tpu.core_type<tc>, window_params = [{transform_indices = @transform_0, window_bounds = array<i64: 1, 4, 256>}, {pipeline_mode = #tpu.pipeline_mode<synchronous>, transform_indices = @transform_1, window_bounds = array<i64: 24, 4>}, {pipeline_mode = #tpu.pipeline_mode<synchronous>, transform_indices = @transform_2, window_bounds = array<i64: 24, 1>}, {pipeline_mode = #tpu.pipeline_mode<synchronous>, transform_indices = @transform_3, window_bounds = array<i64: 24, 9>}, {pipeline_mode = #tpu.pipeline_mode<synchronous>, transform_indices = @transform_4, window_bounds = array<i64: 24, 1>}, {pipeline_mode = #tpu.pipeline_mode<synchronous>, transform_indices = @transform_5, window_bounds = array<i64: 4, 24>}, {pipeline_mode = #tpu.pipeline_mode<synchronous>, transform_indices = @transform_6, window_bounds = array<i64: 4, 1>}, {transform_indices = @transform_7, window_bounds = array<i64: 1, 4, 256>}]} {
    %c0 = arith.constant 0 : index
    %c0_0 = arith.constant 0 : index
    %c0_1 = arith.constant 0 : index
    %0 = vector.load %arg1[%c0, %c0_0, %c0_1] : memref<1x4x256xf32, #tpu.memory_space<vmem>>, vector<1x4x256xf32>
    %1 = vector.shape_cast %0 : vector<1x4x256xf32> to vector<4x256xf32>
    %c0_2 = arith.constant 0 : index
    %c0_3 = arith.constant 0 : index
    %2 = vector.load %arg2[%c0_2, %c0_3] : memref<24x4xf32, #tpu.memory_space<vmem>>, vector<24x4xf32>
    %cst = arith.constant dense<0.000000e+00> : vector<24x256xf32>
    %3 = tpu.matmul %2, %1, %cst {dimension_numbers = #tpu.dot_dimension_numbers<[1], [0], [0], [1], [0, 0, 1, 1], [], []>} : vector<24x4xf32>, vector<4x256xf32>, vector<24x256xf32> -> vector<24x256xf32>
    %c0_4 = arith.constant 0 : index
    %c0_5 = arith.constant 0 : index
    %4 = vector.load %arg3[%c0_4, %c0_5] : memref<24x1xf32, #tpu.memory_space<vmem>>, vector<24x1xf32>
    %5 = vector.broadcast %4 : vector<24x1xf32> to vector<24x256xf32>
    %6 = arith.addf %3, %5 : vector<24x256xf32>
    %cst_6 = arith.constant 0.000000e+00 : f32
    %cst_7 = arith.constant 6.000000e+00 : f32
    %7 = vector.broadcast %cst_6 : f32 to vector<24x256xf32>
    %8 = arith.maximumf %7, %6 : vector<24x256xf32>
    %9 = vector.broadcast %cst_7 : f32 to vector<24x256xf32>
    %10 = arith.minimumf %9, %8 : vector<24x256xf32>
    %11 = tpu.iota {dimensions = array<i32: 1>} : vector<24x256xi32>
    %c15_i32 = arith.constant 15 : i32
    %12 = vector.broadcast %c15_i32 : i32 to vector<24x256xi32>
    %13 = arith.andi %11, %12 : vector<24x256xi32>
    %c4_i32 = arith.constant 4 : i32
    %14 = vector.broadcast %c4_i32 : i32 to vector<24x256xi32>
    %15 = arith.shrsi %11, %14 : vector<24x256xi32>
    %c15_i32_8 = arith.constant 15 : i32
    %16 = vector.broadcast %c15_i32_8 : i32 to vector<24x256xi32>
    %17 = arith.andi %15, %16 : vector<24x256xi32>
    %c0_i32 = arith.constant 0 : i32
    %18 = vector.broadcast %c0_i32 : i32 to vector<24x256xi32>
    %19 = arith.cmpi sgt, %13, %18 : vector<24x256xi32>
    %c15_i32_9 = arith.constant 15 : i32
    %20 = vector.broadcast %c15_i32_9 : i32 to vector<24x256xi32>
    %21 = arith.cmpi slt, %13, %20 : vector<24x256xi32>
    %c0_i32_10 = arith.constant 0 : i32
    %22 = vector.broadcast %c0_i32_10 : i32 to vector<24x256xi32>
    %23 = arith.cmpi sgt, %17, %22 : vector<24x256xi32>
    %c15_i32_11 = arith.constant 15 : i32
    %24 = vector.broadcast %c15_i32_11 : i32 to vector<24x256xi32>
    %25 = arith.cmpi slt, %17, %24 : vector<24x256xi32>
    %c0_12 = arith.constant 0 : index
    %c0_13 = arith.constant 0 : index
    %26 = vector.load %arg4[%c0_12, %c0_13] : memref<24x9xf32, #tpu.memory_space<vmem>>, vector<24x9xf32>
    %c0_14 = arith.constant 0 : index
    %c0_15 = arith.constant 0 : index
    %27 = vector.load %arg5[%c0_14, %c0_15] : memref<24x1xf32, #tpu.memory_space<vmem>>, vector<24x1xf32>
    %28 = vector.shape_cast %27 : vector<24x1xf32> to vector<24x1xf32>
    %29 = vector.broadcast %28 : vector<24x1xf32> to vector<24x256xf32>
    %c17_i32 = arith.constant 17 : i32
    %30 = tpu.dynamic_rotate %10 by %c17_i32 dim 1 : vector<24x256xf32>, i32 -> vector<24x256xf32>
    %cst_16 = arith.constant 0.000000e+00 : f32
    %31 = vector.broadcast %cst_16 : f32 to vector<24x256xf32>
    %32 = arith.select %23, %30, %31 : vector<24x256xi1>, vector<24x256xf32>
    %cst_17 = arith.constant 0.000000e+00 : f32
    %33 = vector.broadcast %cst_17 : f32 to vector<24x256xf32>
    %34 = arith.select %19, %32, %33 : vector<24x256xi1>, vector<24x256xf32>
    %35 = vector.extract_strided_slice %26 {offsets = [0, 0], sizes = [24, 1], strides = [1, 1]} : vector<24x9xf32> to vector<24x1xf32>
    %36 = vector.broadcast %35 : vector<24x1xf32> to vector<24x256xf32>
    %37 = arith.mulf %34, %36 : vector<24x256xf32>
    %38 = arith.addf %29, %37 : vector<24x256xf32>
    %c16_i32 = arith.constant 16 : i32
    %39 = tpu.dynamic_rotate %10 by %c16_i32 dim 1 : vector<24x256xf32>, i32 -> vector<24x256xf32>
    %cst_18 = arith.constant 0.000000e+00 : f32
    %40 = vector.broadcast %cst_18 : f32 to vector<24x256xf32>
    %41 = arith.select %23, %39, %40 : vector<24x256xi1>, vector<24x256xf32>
    %42 = vector.extract_strided_slice %26 {offsets = [0, 1], sizes = [24, 1], strides = [1, 1]} : vector<24x9xf32> to vector<24x1xf32>
    %43 = vector.broadcast %42 : vector<24x1xf32> to vector<24x256xf32>
    %44 = arith.mulf %41, %43 : vector<24x256xf32>
    %45 = arith.addf %38, %44 : vector<24x256xf32>
    %c15_i32_19 = arith.constant 15 : i32
    %46 = tpu.dynamic_rotate %10 by %c15_i32_19 dim 1 : vector<24x256xf32>, i32 -> vector<24x256xf32>
    %cst_20 = arith.constant 0.000000e+00 : f32
    %47 = vector.broadcast %cst_20 : f32 to vector<24x256xf32>
    %48 = arith.select %23, %46, %47 : vector<24x256xi1>, vector<24x256xf32>
    %cst_21 = arith.constant 0.000000e+00 : f32
    %49 = vector.broadcast %cst_21 : f32 to vector<24x256xf32>
    %50 = arith.select %21, %48, %49 : vector<24x256xi1>, vector<24x256xf32>
    %51 = vector.extract_strided_slice %26 {offsets = [0, 2], sizes = [24, 1], strides = [1, 1]} : vector<24x9xf32> to vector<24x1xf32>
    %52 = vector.broadcast %51 : vector<24x1xf32> to vector<24x256xf32>
    %53 = arith.mulf %50, %52 : vector<24x256xf32>
    %54 = arith.addf %45, %53 : vector<24x256xf32>
    %c1_i32 = arith.constant 1 : i32
    %55 = tpu.dynamic_rotate %10 by %c1_i32 dim 1 : vector<24x256xf32>, i32 -> vector<24x256xf32>
    %cst_22 = arith.constant 0.000000e+00 : f32
    %56 = vector.broadcast %cst_22 : f32 to vector<24x256xf32>
    %57 = arith.select %19, %55, %56 : vector<24x256xi1>, vector<24x256xf32>
    %58 = vector.extract_strided_slice %26 {offsets = [0, 3], sizes = [24, 1], strides = [1, 1]} : vector<24x9xf32> to vector<24x1xf32>
    %59 = vector.broadcast %58 : vector<24x1xf32> to vector<24x256xf32>
    %60 = arith.mulf %57, %59 : vector<24x256xf32>
    %61 = arith.addf %54, %60 : vector<24x256xf32>
    %62 = vector.extract_strided_slice %26 {offsets = [0, 4], sizes = [24, 1], strides = [1, 1]} : vector<24x9xf32> to vector<24x1xf32>
    %63 = vector.broadcast %62 : vector<24x1xf32> to vector<24x256xf32>
    %64 = arith.mulf %10, %63 : vector<24x256xf32>
    %65 = arith.addf %61, %64 : vector<24x256xf32>
    %c255_i32 = arith.constant 255 : i32
    %66 = tpu.dynamic_rotate %10 by %c255_i32 dim 1 : vector<24x256xf32>, i32 -> vector<24x256xf32>
    %cst_23 = arith.constant 0.000000e+00 : f32
    %67 = vector.broadcast %cst_23 : f32 to vector<24x256xf32>
    %68 = arith.select %21, %66, %67 : vector<24x256xi1>, vector<24x256xf32>
    %69 = vector.extract_strided_slice %26 {offsets = [0, 5], sizes = [24, 1], strides = [1, 1]} : vector<24x9xf32> to vector<24x1xf32>
    %70 = vector.broadcast %69 : vector<24x1xf32> to vector<24x256xf32>
    %71 = arith.mulf %68, %70 : vector<24x256xf32>
    %72 = arith.addf %65, %71 : vector<24x256xf32>
    %c241_i32 = arith.constant 241 : i32
    %73 = tpu.dynamic_rotate %10 by %c241_i32 dim 1 : vector<24x256xf32>, i32 -> vector<24x256xf32>
    %cst_24 = arith.constant 0.000000e+00 : f32
    %74 = vector.broadcast %cst_24 : f32 to vector<24x256xf32>
    %75 = arith.select %25, %73, %74 : vector<24x256xi1>, vector<24x256xf32>
    %cst_25 = arith.constant 0.000000e+00 : f32
    %76 = vector.broadcast %cst_25 : f32 to vector<24x256xf32>
    %77 = arith.select %19, %75, %76 : vector<24x256xi1>, vector<24x256xf32>
    %78 = vector.extract_strided_slice %26 {offsets = [0, 6], sizes = [24, 1], strides = [1, 1]} : vector<24x9xf32> to vector<24x1xf32>
    %79 = vector.broadcast %78 : vector<24x1xf32> to vector<24x256xf32>
    %80 = arith.mulf %77, %79 : vector<24x256xf32>
    %81 = arith.addf %72, %80 : vector<24x256xf32>
    %c240_i32 = arith.constant 240 : i32
    %82 = tpu.dynamic_rotate %10 by %c240_i32 dim 1 : vector<24x256xf32>, i32 -> vector<24x256xf32>
    %cst_26 = arith.constant 0.000000e+00 : f32
    %83 = vector.broadcast %cst_26 : f32 to vector<24x256xf32>
    %84 = arith.select %25, %82, %83 : vector<24x256xi1>, vector<24x256xf32>
    %85 = vector.extract_strided_slice %26 {offsets = [0, 7], sizes = [24, 1], strides = [1, 1]} : vector<24x9xf32> to vector<24x1xf32>
    %86 = vector.broadcast %85 : vector<24x1xf32> to vector<24x256xf32>
    %87 = arith.mulf %84, %86 : vector<24x256xf32>
    %88 = arith.addf %81, %87 : vector<24x256xf32>
    %c239_i32 = arith.constant 239 : i32
    %89 = tpu.dynamic_rotate %10 by %c239_i32 dim 1 : vector<24x256xf32>, i32 -> vector<24x256xf32>
    %cst_27 = arith.constant 0.000000e+00 : f32
    %90 = vector.broadcast %cst_27 : f32 to vector<24x256xf32>
    %91 = arith.select %25, %89, %90 : vector<24x256xi1>, vector<24x256xf32>
    %cst_28 = arith.constant 0.000000e+00 : f32
    %92 = vector.broadcast %cst_28 : f32 to vector<24x256xf32>
    %93 = arith.select %21, %91, %92 : vector<24x256xi1>, vector<24x256xf32>
    %94 = vector.extract_strided_slice %26 {offsets = [0, 8], sizes = [24, 1], strides = [1, 1]} : vector<24x9xf32> to vector<24x1xf32>
    %95 = vector.broadcast %94 : vector<24x1xf32> to vector<24x256xf32>
    %96 = arith.mulf %93, %95 : vector<24x256xf32>
    %97 = arith.addf %88, %96 : vector<24x256xf32>
    %cst_29 = arith.constant 0.000000e+00 : f32
    %cst_30 = arith.constant 6.000000e+00 : f32
    %98 = vector.broadcast %cst_29 : f32 to vector<24x256xf32>
    %99 = arith.maximumf %98, %97 : vector<24x256xf32>
    %100 = vector.broadcast %cst_30 : f32 to vector<24x256xf32>
    %101 = arith.minimumf %100, %99 : vector<24x256xf32>
    %c0_31 = arith.constant 0 : index
    %c0_32 = arith.constant 0 : index
    %102 = vector.load %arg6[%c0_31, %c0_32] : memref<4x24xf32, #tpu.memory_space<vmem>>, vector<4x24xf32>
    %cst_33 = arith.constant dense<0.000000e+00> : vector<4x256xf32>
    %103 = tpu.matmul %102, %101, %cst_33 {dimension_numbers = #tpu.dot_dimension_numbers<[1], [0], [0], [1], [0, 0, 1, 1], [], []>} : vector<4x24xf32>, vector<24x256xf32>, vector<4x256xf32> -> vector<4x256xf32>
    %c0_34 = arith.constant 0 : index
    %c0_35 = arith.constant 0 : index
    %104 = vector.load %arg7[%c0_34, %c0_35] : memref<4x1xf32, #tpu.memory_space<vmem>>, vector<4x1xf32>
    %105 = vector.broadcast %104 : vector<4x1xf32> to vector<4x256xf32>
    %106 = arith.addf %103, %105 : vector<4x256xf32>
    %107 = arith.addf %106, %1 : vector<4x256xf32>
    %c0_36 = arith.constant 0 : index
    %c0_37 = arith.constant 0 : index
    %c0_38 = arith.constant 0 : index
    %108 = vector.load %arg8[%c0_36, %c0_37, %c0_38] : memref<1x4x256xf32, #tpu.memory_space<vmem>>, vector<1x4x256xf32>
    %109 = vector.shape_cast %108 : vector<1x4x256xf32> to vector<4x256xf32>
    %110 = vector.shape_cast %107 : vector<4x256xf32> to vector<1x4x256xf32>
    tpu.vector_store %arg8[%c0_36, %c0_37, %c0_38], %110 {strides = array<i32>} : memref<1x4x256xf32, #tpu.memory_space<vmem>>, vector<1x4x256xf32>,
    return
  }
  func.func @transform_0(%arg0: i32) -> (i32, i32, i32) {
    %c0_i32 = arith.constant 0 : i32
    %c0_i32_0 = arith.constant 0 : i32
    %c0_i32_1 = arith.constant 0 : i32
    return %arg0, %c0_i32, %c0_i32_0 : i32, i32, i32
  }
  func.func @transform_1(%arg0: i32) -> (i32, i32) {
    %c0_i32 = arith.constant 0 : i32
    %c0_i32_0 = arith.constant 0 : i32
    %c0_i32_1 = arith.constant 0 : i32
    return %c0_i32, %c0_i32_0 : i32, i32
  }
  func.func @transform_2(%arg0: i32) -> (i32, i32) {
    %c0_i32 = arith.constant 0 : i32
    %c0_i32_0 = arith.constant 0 : i32
    %c0_i32_1 = arith.constant 0 : i32
    return %c0_i32, %c0_i32_0 : i32, i32
  }
  func.func @transform_3(%arg0: i32) -> (i32, i32) {
    %c0_i32 = arith.constant 0 : i32
    %c0_i32_0 = arith.constant 0 : i32
    %c0_i32_1 = arith.constant 0 : i32
    return %c0_i32, %c0_i32_0 : i32, i32
  }
  func.func @transform_4(%arg0: i32) -> (i32, i32) {
    %c0_i32 = arith.constant 0 : i32
    %c0_i32_0 = arith.constant 0 : i32
    %c0_i32_1 = arith.constant 0 : i32
    return %c0_i32, %c0_i32_0 : i32, i32
  }
  func.func @transform_5(%arg0: i32) -> (i32, i32) {
    %c0_i32 = arith.constant 0 : i32
    %c0_i32_0 = arith.constant 0 : i32
    %c0_i32_1 = arith.constant 0 : i32
    return %c0_i32, %c0_i32_0 : i32, i32
  }
  func.func @transform_6(%arg0: i32) -> (i32, i32) {
    %c0_i32 = arith.constant 0 : i32
    %c0_i32_0 = arith.constant 0 : i32
    %c0_i32_1 = arith.constant 0 : i32
    return %c0_i32, %c0_i32_0 : i32, i32
  }
  func.func @transform_7(%arg0: i32) -> (i32, i32, i32) {
    %c0_i32 = arith.constant 0 : i32
    %c0_i32_0 = arith.constant 0 : i32
    %c0_i32_1 = arith.constant 0 : i32
    return %arg0, %c0_i32, %c0_i32_0 : i32, i32, i32
  }
}

</mosaic_0001>

<bundles_post_ra>
// kernel: tpu_custom_call.1
= control target key start
LH: loop header
LB: loop body
LE: loop exit
PB: predicated region body
PF: predicated region fallthrough
CT: control target
= control target key end

     0   :  { %12 = vsyncpa [#allocation3], 0  ;;  %s1960_s0 = inlined_call_operand.vmem [shape: f32[2,4,256], index: 0, kind: input, shape index: {}]   ;;  %s1961_s1 = inlined_call_operand.vmem [shape: f32[24,4], index: 1, kind: input, shape index: {}]   ;;  %s1962_s2 = inlined_call_operand.vmem [shape: f32[24,1], index: 2, kind: input, shape index: {}]   ;;  %s1963_s3 = inlined_call_operand.vmem [shape: f32[24,9], index: 3, kind: input, shape index: {}]   ;;  %s1964_s4 = inlined_call_operand.vmem [shape: f32[24,1], index: 4, kind: input, shape index: {}]   ;;  %s1965_s5 = inlined_call_operand.vmem [shape: f32[4,24], index: 5, kind: input, shape index: {}]   ;;  %s1966_s6 = inlined_call_operand.vmem [shape: f32[4,1], index: 6, kind: input, shape index: {}]   ;;  %s1967_s7 = inlined_call_operand.hbm [shape: f32[2,4,256], index: 7, kind: output, shape index: {}]  }
   0x1   :  { %14 = vsyncpa [#allocation3 + $0x1], 0  ;;  %s1241_s24 = smov 0   ;;  %s1243_s25 = smov 0  }
   0x2   :  { %s1245_s26 = smov 0   ;;  %s1247_s27 = smov 0  }
   0x3 LB: > { %s1262_s28 = sadd.s32 4294967295, %s1182_s27   ;;  %s1015_s29 = sadd.s32 4294967294, %s1182_s27   ;;  %s1182_s27 = sphi %s1247_s27, %s1981_s27   ;;  %s1178_s26 = sphi %s1245_s26, %s1980_s26   ;;  %s1174_s25 = sphi %s1243_s25, %s1979_s25   ;;  %s1170_s24 = sphi %s1241_s24, %s1978_s24  }
   0x4   : > { %s1266_s30 = sadd.s32 1, %s1182_s27   ;;  %s179_s8 = sadd.s32 1, %s1178_s26 }
   0x5   : > { %s176_s9 = ssub.s32 %s1182_s27, %s1266_s30  ;;  %p189_p0 = scmp.ne.s32.totalorder %s1178_s26, %s1174_s25 }
   0x6   : > { %p177_p1 = scmp.eq.s32.totalorder %s176_s9, 0  ;;  %p190_p2 = scmp.eq.s32.totalorder %s1262_s28, 1 }
   0x7   : > { %p195_p3 = scmp.ne.s32.totalorder %s1174_s25, %s1170_s24  ;;  %p196_p4 = scmp.eq.s32.totalorder %s1015_s29, 1 }
   0x8   : > { %s1277_s10 = scalar_select %p177_p1, %s1178_s26, %s179_s8  }
   0x9   : > { %p1279_p5 = por %p190_p2, %p189_p0  ;;  %p1283_p6 = por %p196_p4, %p195_p3 }
   0xa   : > { %p1018_p7 = scmp.ge.s32.totalorder %s1182_s27, 1  ;;  %p240_p8 = scmp.lt.s32.totalorder %s1182_s27, 3 }
   0xc   : > { %p241_p9 = pnand %p1018_p7, %p240_p8 }
   0xd   : > { %p272_p10 = scmp.lt.s32.totalorder (!%p241_p9), %s1262_s28, 1  ;;  %s1190_s14 = smov (!%p241_p9), 1  }
   0xe   : > { %244 = sbr.rel (%p241_p9) target bundleno = 600 (0x258), region = 48  ;;  %s1191_s15 = smov (!%p241_p9), 15  }
   0xf   : > { %s1192_s16 = smov (!%p241_p9), 17   ;;  %s1195_s19 = smov (!%p241_p9), 113  }
  0x10   : > { %s1197_s20 = smov (!%p241_p9), 112   ;;  %s269_s9 = sand.u32 (!%p241_p9), 1, %s1174_s25  }
  0x11   : > { %s1019_s13 = sshll.u32 (!%p241_p9), %s269_s9, 3  ;;  %s1140_s8 = scalar_lea.hbm (!%p241_p9), %s1967_s7, 16 }
  0x13   : > { %v403_v0 = vld [vmem:[%s1964_s4 + $0x8] sm:$0xff]  ;;  %v281_v1 = vld [vmem:[%s1962_s2] sm:$0xff]  ;;  %v1184_v2 = vmov 0   ;;  %s273_s17 = scalar_select %p272_p10, %s1262_s28, 1  ;;  %v404_v4 = vld [vmem:[%s1964_s4 + $0x10] sm:$0xff]  ;;  %vm313_vm0 = vcmask 1043456  }
  0x14   : > { %1097 = vset.pattern.permute.xlu2 %v1184_v2  ;;  %1095 = vset.pattern.permute.xlu0 %v1184_v2  ;;  %v282_v5 = vld [vmem:[%s1962_s2 + $0x8] sm:$0xff]  ;;  %v278_v6 = vld [vmem:[%s1961_s1] sm:$0xff]  ;;  %vm303_vm1 = vcmask 31744   ;;  %v1317_v9 = vld [vmem:[%s1963_s3 + $0x10] sm:$0xff]  ;;  %v1185_v13 = vmov 1   ;;  %v1186_v16 = vmov 2  }
  0x15   : > { %412 = vperm.xlu2 %1097, %v403_v0   ;;  %286 = vperm.xlu0 %1095, %v281_v1   ;;  %s1037_s18 = sshll.u32 %s273_s17, 3  ;;  %v1322_v10 = vld [vmem:[%s1963_s3] sm:$0xff]  ;;  %v279_v11 = vld [vmem:[%s1961_s1 + $0x8] sm:$0xff]  ;;  %v283_v12 = vld [vmem:[%s1962_s2 + $0x10] sm:$0xff]  ;;  %v1187_v18 = vmov 4   ;;  %v1188_v19 = vmov 5  }
  0x16   : > { %1096 = vset.pattern.permute.xlu1 %v1184_v2  ;;  %s276_s21 = scalar_lea.vmem %s1960_s0, %s1037_s18  ;;  %v280_v14 = vld [vmem:[%s1961_s1 + $0x10] sm:$0xff]  ;;  %v1346_v15 = vld [vmem:[%s1963_s3 + $0x8] sm:$0xff]  ;;  %v402_v17 = vld [vmem:[%s1964_s4] sm:$0xff]  ;;  %v1189_v20 = vmov 3   ;;  %s1193_s17 = smov 16   ;;  %v1196_v54 = vmov 6  }
  0x17   : > { %v277_v3 = vld [vmem:[%s276_s21] sm:$0xff]  ;;  %296 = vperm.xlu1 %1096, %v283_v12   ;;  %s1194_s18 = smov 127   ;;  %s1198_s21 = smov 111  }
  0x18   : > { %300 = vst [vmem:[#allocation1] ss:$2 sm:$0xff] %v277_v3 }
  0x1d   : > { %417 = vperm.xlu2 %1097, %v404_v4   ;;  %291 = vperm.xlu0 %1095, %v282_v5  }
  0x1f   : > { %v301_v7 = vld.sshfl [vmem:[#allocation1] sm:$0xff pattern:$0x75316420]  ;;  %v302_v8 = vld.sshfl [vmem:[#allocation1 + $0x8] sm:$0xff pattern:$0x75316420]  ;;  %407 = vperm.xlu1 %1096, %v402_v17  }
  0x20   : > { %1022 = vmatpush.msk.msra.mxu0 %vm313_vm0, %v301_v7  ;;  %1026 = vmatpush.msk.msra.mxu1 %vm313_vm0, %v302_v8  ;;  %926 = vst [vmem:[#allocation1] ss:$2 sm:$0xff] %v277_v3  ;;  %v1200_v17 = vmov 7  }
  0x21   : > { %1023 = vmatmul.msk.f32.vlgmr.msra.gmra.mxu0 %vm303_vm1, %v278_v6  ;;  %1027 = vmatmul.msk.f32.vlgmr.msra.gmra.mxu1 %vm303_vm1, %v278_v6  ;;  %v382_v6 = vlaneseq }
  0x23   : > { %v1488_v7 = vand.u32 127, %v382_v6 }
  0x25   : > { %463 = vperm.xlu2 %1097, %v1317_v9   ;;  %453 = vperm.xlu0 %1095, %v1322_v10   ;;  %vm539_vm2 = vcmp.lt.s32.totalorder %v1488_v7, 15  ;;  %vm432_vm3 = vcmp.lt.s32.totalorder %v1488_v7, 17  ;;  %vm594_vm4 = vcmp.lt.s32.totalorder %v1488_v7, 1  ;;  %vm490_vm9 = vcmp.lt.s32.totalorder %v1488_v7, 16 }
  0x26   : > { %vm667_vm12 = vcmp.lt.s32.totalorder %v1488_v7, 127  ;;  %vm716_vm13 = vcmp.lt.s32.totalorder %v1488_v7, 113 }
  0x27   : > { %458 = vperm.xlu1 %1096, %v1346_v15  }
  0x29   : > { %1024 = vmatmul.msk.f32.gmra.mxu0 %vm303_vm1, %v279_v11  ;;  %1028 = vmatmul.msk.f32.gmra.mxu1 %vm303_vm1, %v279_v11  ;;  %v1199_v11 = vmov 8  }
  0x2d   : > { %1100 = vset.pattern.permute.xlu2 %v1185_v13  ;;  %1098 = vset.pattern.permute.xlu0 %v1185_v13 }
  0x2e   : > { %512 = vperm.xlu2 %1100, %v1317_v9   ;;  %504 = vperm.xlu0 %1098, %v1322_v10  }
  0x2f   : > { %1099 = vset.pattern.permute.xlu1 %v1185_v13 }
  0x30   : > { %508 = vperm.xlu1 %1099, %v1346_v15  }
  0x31   : > { %1025 = vmatmul.msk.f32.gmra.mxu0 %vm303_vm1, %v280_v14  ;;  %1029 = vmatmul.msk.f32.gmra.mxu1 %vm303_vm1, %v280_v14  ;;  %vm771_vm1 = vcmp.lt.s32.totalorder %v1488_v7, 112 }
  0x36   : > { %1102 = vset.pattern.permute.xlu2 %v1186_v16  ;;  %1103 = vset.pattern.permute.xlu0 %v1186_v16 }
  0x37   : > { %563 = vperm.xlu2 %1102, %v1346_v15   ;;  %567 = vperm.xlu0 %1103, %v1317_v9  }
  0x38   : > { %1101 = vset.pattern.permute.xlu1 %v1186_v16 }
  0x39   : > { %559 = vperm.xlu1 %1101, %v1322_v10  }
  0x3f   : > { %1106 = vset.pattern.permute.xlu2 %v1187_v18  ;;  %1104 = vset.pattern.permute.xlu0 %v1189_v20 }
  0x40   : > { %640 = vperm.xlu2 %1106, %v1317_v9   ;;  %616 = vperm.xlu0 %1104, %v1317_v9  }
  0x41   : > { %1105 = vset.pattern.permute.xlu1 %v1189_v20 }
  0x42   : > { %612 = vperm.xlu1 %1105, %v1346_v15  }
  0x48   : > { %636 = vperm.xlu2 %1106, %v1346_v15   ;;  %1110 = vset.pattern.permute.xlu0 %v1196_v54 }
  0x4a   : > { %608 = vperm.xlu1 %1105, %v1322_v10  }
  0x50   : > { %1107 = vset.pattern.permute.xlu2 %v1188_v19 }
  0x51   : > { %689 = vperm.xlu2 %1107, %v1317_v9  }
  0x52   : > { %1112 = vset.pattern.permute.xlu1 %v1196_v54 }
  0x59   : > { %1108 = vset.pattern.permute.xlu2 %v1187_v18 }
  0x5a   : > { %632 = vperm.xlu2 %1108, %v1322_v10  }
  0x62   : > { %1109 = vset.pattern.permute.xlu2 %v1188_v19 }
  0x63   : > { %685 = vperm.xlu2 %1109, %v1346_v15  }
  0x6f   : > { %v1364_v22 = vpop.permute.xlu2 %412 }
  0x77   : > { %v1376_v33 = vpop.permute.xlu2 %417 }
  0x7f   : > { %v1386_v40 = vpop.permute.xlu2 %463 }
  0x87   : > { %v287_v21 = vpop.permute.xlu0 %286 }
  0x88   : > { %v1396_v45 = vpop.permute.xlu2 %512 }
  0x89   : > { %v297_v42 = vpop.permute.xlu1 %296 }
  0x8f   : > { %v292_v31 = vpop.permute.xlu0 %291 }
  0x91   : > { %v1406_v50 = vpop.permute.xlu2 %563  ;;  %v1438_v56 = vpop.permute.xlu1 %407 }
  0x97   : > { %v1460_v61 = vpop.permute.xlu0 %453 }
  0x99   : > { %v1448_v58 = vpop.permute.xlu1 %458 }
  0x9a   : > { %v1422_v53 = vpop.permute.xlu2 %640 }
  0x9e   : > { %v335_v23 = vpop.f32.mrf.mxu0  ;;  %v361_v24 = vpop.f32.mrf.mxu1 }
  0x9f   : > { %v336_v25 = vadd.f32 %v335_v23, %v287_v21  ;;  %v362_v26 = vadd.f32 %v361_v24, %v287_v21  ;;  %v384_v21 = vadd.s32 128, %v1488_v7  ;;  %v387_v23 = vshra.s32 %v1488_v7, 4 }
  0xa0   : > { %v1470_v63 = vpop.permute.xlu0 %504 }
  0xa1   : > { %v370_v27 = vmax.f32 %v336_v25, 0.0  ;;  %v371_v28 = vmax.f32 %v362_v26, 0.0  ;;  %v388_v24 = vshra.s32 %v384_v21, 4 }
  0xa2   : > { %v1430_v55 = vpop.permute.xlu2 %636  ;;  %v1458_v60 = vpop.permute.xlu1 %508 }
  0xa3   : > { %v1366_v29 = vmin.f32 %v370_v27, 6.0  ;;  %v1368_v30 = vmin.f32 %v371_v28, 6.0 }
  0xa5   : > { %588 = vrot.lane.b32.xlu2 %v1368_v30, %s1190_s14  ;;  %527 = vrot.lane.b32.xlu1 %v1366_v29, %s1191_s15 }
  0xa6   : > { %420 = vrot.lane.b32.xlu0 %v1366_v29, %s1192_s16  ;;  %v338_v32 = vpop.f32.mrf.mxu0  ;;  %v364_v35 = vpop.f32.mrf.mxu1 }
  0xa7   : > { %v339_v34 = vadd.f32 %v338_v32, %v292_v31  ;;  %v365_v38 = vadd.f32 %v364_v35, %v292_v31  ;;  %v1533_v35 = vand.u32 15, %v387_v23 }
  0xa9   : > { %v372_v36 = vmax.f32 %v339_v34, 0.0  ;;  %v373_v39 = vmax.f32 %v365_v38, 0.0  ;;  %v1479_v3 = vpop.permute.xlu0 %567  ;;  %v385_v38 = vand.u32 15, %v1488_v7  ;;  %vm395_vm5 = vcmp.gt.s32.totalorder %v1533_v35, 0 }
  0xaa   : > { %vm397_vm14 = vcmp.lt.s32.totalorder %v1533_v35, 15 }
  0xab   : > { %v1378_v37 = vmin.f32 %v372_v36, 6.0  ;;  %v1388_v41 = vmin.f32 %v373_v39, 6.0  ;;  %v1440_v57 = vpop.permute.xlu2 %689  ;;  %v1472_v0 = vpop.permute.xlu1 %559  ;;  %v1535_v36 = vand.u32 15, %v388_v24  ;;  %v386_v39 = vand.u32 15, %v384_v21 }
  0xac   : > { %vm1544_vm7 = vcmp.gt.s32.totalorder %v385_v38, 0  ;;  %vm1590_vm10 = vcmp.lt.s32.totalorder %v385_v38, 15 }
  0xad   : > { %529 = vrot.lane.b32.xlu2 %v1378_v37, %s1191_s15  ;;  %533 = vrot.lane.b32.xlu1 %v1368_v30, %s1191_s15  ;;  %vm396_vm6 = vcmp.gt.s32.totalorder %v1535_v36, 0  ;;  %vm1548_vm8 = vcmp.gt.s32.totalorder %v386_v39, 0  ;;  %vm1594_vm11 = vcmp.lt.s32.totalorder %v386_v39, 15  ;;  %vm398_vm15 = vcmp.lt.s32.totalorder %v1535_v36, 15 }
  0xae   : > { %426 = vrot.lane.b32.xlu0 %v1368_v30, %s1192_s16  ;;  %v341_v43 = vpop.f32.mrf.mxu0  ;;  %v367_v47 = vpop.f32.mrf.mxu1 }
  0xaf   : > { %v342_v44 = vadd.f32 %v341_v43, %v297_v42  ;;  %v368_v49 = vadd.f32 %v367_v47, %v297_v42  ;;  %v876_v43 = vld [vmem:[%s1966_s6] sm:$0xf] }
  0xb1   : > { %v374_v46 = vmax.f32 %v342_v44, 0.0  ;;  %v375_v51 = vmax.f32 %v368_v49, 0.0 }
  0xb2   : > { %v1496_v8 = vpop.permute.xlu0 %616 }
  0xb3   : > { %v1404_v48 = vmin.f32 %v374_v46, 6.0  ;;  %v1414_v52 = vmin.f32 %v375_v51, 6.0 }
  0xb4   : > { %v1450_v59 = vpop.permute.xlu2 %632  ;;  %v1481_v4 = vpop.permute.xlu1 %612 }
  0xb5   : > { %535 = vrot.lane.b32.xlu2 %v1388_v41, %s1191_s15  ;;  %582 = vrot.lane.b32.xlu1 %v1366_v29, %s1190_s14 }
  0xb6   : > { %478 = vrot.lane.b32.xlu0 %v1366_v29, %s1193_s17 }
  0xbc   : > { %v609_v12 = vpop.permute.xlu1 %608 }
  0xbd   : > { %590 = vrot.lane.b32.xlu2 %v1388_v41, %s1190_s14  ;;  %661 = vrot.lane.b32.xlu1 %v1368_v30, %s1194_s18  ;;  %v1466_v62 = vpop.permute.xlu2 %685 }
  0xbe   : > { %484 = vrot.lane.b32.xlu0 %v1368_v30, %s1193_s17 }
  0xc5   : > { %424 = vrot.lane.b32.xlu2 %v1404_v48, %s1192_s16  ;;  %422 = vrot.lane.b32.xlu1 %v1378_v37, %s1192_s16 }
  0xc6   : > { %655 = vrot.lane.b32.xlu0 %v1366_v29, %s1194_s18 }
  0xcd   : > { %430 = vrot.lane.b32.xlu2 %v1414_v52, %s1192_s16  ;;  %428 = vrot.lane.b32.xlu1 %v1388_v41, %s1192_s16 }
  0xce   : > { %657 = vrot.lane.b32.xlu0 %v1378_v37, %s1194_s18 }
  0xd5   : > { %482 = vrot.lane.b32.xlu2 %v1404_v48, %s1193_s17  ;;  %480 = vrot.lane.b32.xlu1 %v1378_v37, %s1193_s17 }
  0xd6   : > { %706 = vrot.lane.b32.xlu0 %v1378_v37, %s1195_s19 }
  0xdd   : > { %488 = vrot.lane.b32.xlu2 %v1414_v52, %s1193_s17  ;;  %486 = vrot.lane.b32.xlu1 %v1388_v41, %s1193_s17 }
  0xde   : > { %531 = vrot.lane.b32.xlu0 %v1404_v48, %s1191_s15 }
  0xe5   : > { %592 = vrot.lane.b32.xlu2 %v1414_v52, %s1190_s14  ;;  %584 = vrot.lane.b32.xlu1 %v1378_v37, %s1190_s14 }
  0xe6   : > { %537 = vrot.lane.b32.xlu0 %v1414_v52, %s1191_s15 }
  0xed   : > { %708 = vrot.lane.b32.xlu2 %v1404_v48, %s1195_s19  ;;  %663 = vrot.lane.b32.xlu1 %v1388_v41, %s1194_s18 }
  0xee   : > { %659 = vrot.lane.b32.xlu0 %v1404_v48, %s1194_s18 }
  0xf5   : > { %769 = vrot.lane.b32.xlu2 %v1414_v52, %s1197_s20  ;;  %712 = vrot.lane.b32.xlu1 %v1388_v41, %s1195_s19 }
  0xf6   : > { %714 = vrot.lane.b32.xlu0 %v1414_v52, %s1195_s19 }
  0xfd   : > { %710 = vrot.lane.b32.xlu2 %v1368_v30, %s1195_s19  ;;  %586 = vrot.lane.b32.xlu1 %v1404_v48, %s1190_s14  ;;  %s1038_s14 = sshll.u32 %s1262_s28, 3  ;;  %s940_s28 = scalar_lea.sflag [#allocation3], %s269_s9 }
  0xfe   : > { %744 = vperm.xlu0 %1110, %v1317_v9   ;;  %s951_s17 = scalar_lea.hbm %s1967_s7, %s1038_s14 }
  0xff   : > { %v589_v1 = vpop.permute.xlu2 %588 }
 0x105   : > { %681 = vperm.xlu2 %1109, %v1322_v10   ;;  %665 = vrot.lane.b32.xlu1 %v1414_v52, %s1194_s18  ;;  %s271_s18 = scalar_lea.vmem [#allocation2], %s1019_s13 }
 0x106   : > { %812 = vrot.lane.b32.xlu0 %v1404_v48, %s1198_s21 }
 0x107   : > { %v530_v5 = vpop.permute.xlu2 %529 }
 0x10d   : > { %767 = vrot.lane.b32.xlu2 %v1388_v41, %s1197_s20  ;;  %763 = vrot.lane.b32.xlu1 %v1404_v48, %s1197_s20 }
 0x10e   : > { %740 = vperm.xlu0 %1110, %v1346_v15   ;;  %1114 = vset.pattern.permute.xlu2 %v1199_v11 }
 0x10f   : > { %v536_v13 = vpop.permute.xlu2 %535 }
 0x110   : > { %v1501_v14 = vsel %vm539_vm2, %v530_v5, %v536_v13  ;;  %v1505_v16 = vsel %vm539_vm2, %v536_v13, %v530_v5 }
 0x115   : > { %816 = vrot.lane.b32.xlu2 %v1388_v41, %s1198_s21  ;;  %704 = vrot.lane.b32.xlu1 %v1366_v29, %s1195_s19  ;;  %s953_s19 = sshll.u32 %s271_s18, 4  ;;  %s954_s19 = int_to_ptr.vmem [resolvable:$true] %s953_s19 }
 0x116   : > { %1111 = vset.pattern.permute.xlu0 %v1200_v17 }
 0x117   : > { %793 = vperm.xlu0 %1111, %v1317_v9   ;;  %v1513_v18 = vpop.permute.xlu2 %590  ;;  %v528_v19 = vpop.permute.xlu1 %527 }
 0x118   : > { %v421_v20 = vpop.permute.xlu0 %420 }
 0x11d   : > { %759 = vrot.lane.b32.xlu2 %v1366_v29, %s1197_s20  ;;  %818 = vrot.lane.b32.xlu1 %v1414_v52, %s1198_s21 }
 0x11f   : > { %765 = vrot.lane.b32.xlu0 %v1368_v30, %s1197_s20  ;;  %v425_v25 = vpop.permute.xlu2 %424  ;;  %v534_v26 = vpop.permute.xlu1 %533 }
 0x120   : > { %v540_v27 = vsel %vm539_vm2, %v528_v19, %v534_v26  ;;  %v543_v28 = vsel %vm539_vm2, %v534_v26, %v528_v19  ;;  %v427_v31 = vpop.permute.xlu0 %426  ;;  %1116 = vset.pattern.permute.xlu0 %v1199_v11 }
 0x121   : > { %v433_v32 = vsel %vm432_vm3, %v421_v20, %v427_v31  ;;  %v436_v34 = vsel %vm432_vm3, %v427_v31, %v421_v20  ;;  %v547_v26 = vsel %vm396_vm6, %v540_v27, 0.0 }
 0x122   : > { %v439_v5 = vsel %vm395_vm5, %v436_v34, 0.0  ;;  %v440_v6 = vsel %vm396_vm6, %v433_v32, 0.0  ;;  %v553_v39 = vsel %vm1594_vm11, %v547_v26, 0.0 }
 0x123   : > { %v445_v23 = vsel %vm1544_vm7, %v439_v5, 0.0 }
 0x124   : > { %v466_v31 = vmul.f32 %v1460_v61, %v445_v23 }
 0x125   : > { %761 = vrot.lane.b32.xlu1 %v1378_v37, %s1197_s20  ;;  %848 = vperm.xlu2 %1114, %v1317_v9   ;;  %s955_s20 = sshll.u32 %s951_s17, 4  ;;  %s956_s20 = int_to_ptr.hbm [resolvable:$true] %s955_s20 }
 0x127   : > { %808 = vrot.lane.b32.xlu0 %v1366_v29, %s1198_s21  ;;  %v431_v44 = vpop.permute.xlu2 %430  ;;  %v583_v46 = vpop.permute.xlu1 %582 }
 0x128   : > { %v435_v9 = vsel %vm432_vm3, %v425_v25, %v431_v44  ;;  %v438_v47 = vsel %vm432_vm3, %v431_v44, %v425_v25  ;;  %v595_v49 = vsel %vm594_vm4, %v583_v46, %v589_v1  ;;  %v598_v51 = vsel %vm594_vm4, %v589_v1, %v583_v46  ;;  %v479_v54 = vpop.permute.xlu0 %478  ;;  %v875_v46 = vld [vmem:[%s1965_s5] sm:$0xf] }
 0x129   : > { %v601_v13 = vsel %vm1544_vm7, %v598_v51, 0.0  ;;  %v602_v19 = vsel %vm1548_vm8, %v595_v49, 0.0  ;;  %v446_v1 = vsel %vm1548_vm8, %v440_v6, 0.0  ;;  %v443_v24 = vsel %vm395_vm5, %v438_v47, 0.0 }
 0x12a   : > { %v619_v20 = vmul.f32 %v609_v12, %v601_v13  ;;  %v620_v21 = vmul.f32 %v609_v12, %v602_v19  ;;  %v444_v25 = vsel %vm396_vm6, %v435_v9, 0.0  ;;  %v546_v12 = vsel %vm395_vm5, %v543_v28, 0.0 }
 0x12b   : > { %v467_v32 = vmul.f32 %v1460_v61, %v446_v1  ;;  %v449_v27 = vsel %vm1544_vm7, %v443_v24, 0.0  ;;  %v450_v47 = vsel %vm1548_vm8, %v444_v25, 0.0  ;;  %v552_v49 = vsel %vm1590_vm10, %v546_v12, 0.0 }
 0x12c   : > { %v472_v6 = vadd.f32 %v466_v31, %v1438_v56  ;;  %v470_v23 = vmul.f32 %v1386_v40, %v449_v27  ;;  %v471_v1 = vmul.f32 %v1386_v40, %v450_v47  ;;  %v570_v24 = vmul.f32 %v1472_v0, %v552_v49 }
 0x12d   : > { %810 = vrot.lane.b32.xlu1 %v1378_v37, %s1198_s21  ;;  %1115 = vset.pattern.permute.xlu2 %v1200_v17  ;;  %v473_v13 = vadd.f32 %v467_v32, %v1438_v56  ;;  %v571_v25 = vmul.f32 %v1472_v0, %v553_v39  ;;  %v643_v56 = vmul.f32 %v1450_v59, %v1366_v29 }
 0x12e   : > { %785 = vperm.xlu2 %1115, %v1322_v10   ;;  %v476_v0 = vadd.f32 %v470_v23, %v1376_v33  ;;  %v477_v27 = vadd.f32 %v471_v1, %v1376_v33 }
 0x12f   : > { %v483_v34 = vpop.permute.xlu2 %482  ;;  %v662_v44 = vpop.permute.xlu1 %661  ;;  %844 = vperm.xlu0 %1116, %v1346_v15  }
 0x130   : > { %v485_v28 = vpop.permute.xlu0 %484 }
 0x131   : > { %v491_v61 = vsel %vm490_vm9, %v479_v54, %v485_v28  ;;  %v494_v38 = vsel %vm490_vm9, %v485_v28, %v479_v54 }
 0x132   : > { %v497_v51 = vsel %vm395_vm5, %v494_v38, 0.0  ;;  %v498_v5 = vsel %vm396_vm6, %v491_v61, 0.0 }
 0x133   : > { %v515_v19 = vmul.f32 %v1470_v63, %v497_v51  ;;  %v516_v54 = vmul.f32 %v1470_v63, %v498_v5  ;;  %v644_v63 = vmul.f32 %v1450_v59, %v1368_v30 }
 0x135   : > { %v521_v12 = vadd.f32 %v515_v19, %v472_v6  ;;  %v522_v26 = vadd.f32 %v516_v54, %v473_v13  ;;  %736 = vperm.xlu1 %1112, %v1322_v10  }
 0x136   : > { %1118 = vset.pattern.permute.xlu2 %v1184_v2 }
 0x137   : > { %v576_v31 = vadd.f32 %v570_v24, %v521_v12  ;;  %v577_v40 = vadd.f32 %v571_v25, %v522_v26  ;;  %v489_v32 = vpop.permute.xlu2 %488  ;;  %v423_v28 = vpop.permute.xlu1 %422  ;;  %1119 = vset.pattern.permute.xlu0 %v1184_v2  ;;  %879 = vperm.xlu2 %1118, %v876_v43  }
 0x138   : > { %v493_v47 = vsel %vm490_vm9, %v483_v34, %v489_v32  ;;  %v496_v61 = vsel %vm490_vm9, %v489_v32, %v483_v34  ;;  %v656_v29 = vpop.permute.xlu0 %655 }
 0x139   : > { %v501_v59 = vsel %vm395_vm5, %v496_v61, 0.0  ;;  %v502_v38 = vsel %vm396_vm6, %v493_v47, 0.0  ;;  %v1642_v2 = vsel %vm667_vm12, %v656_v29, %v662_v44  ;;  %v1646_v33 = vsel %vm667_vm12, %v662_v44, %v656_v29 }
 0x13a   : > { %v519_v49 = vmul.f32 %v1396_v45, %v501_v59  ;;  %v520_v39 = vmul.f32 %v1396_v45, %v502_v38  ;;  %v625_v34 = vadd.f32 %v619_v20, %v576_v31  ;;  %v626_v51 = vadd.f32 %v620_v21, %v577_v40 }
 0x13c   : > { %v1650_v5 = vadd.f32 %v519_v49, %v476_v0  ;;  %v1652_v6 = vadd.f32 %v520_v39, %v477_v27  ;;  %v1654_v13 = vadd.f32 %v643_v56, %v625_v34  ;;  %v1656_v19 = vadd.f32 %v644_v63, %v626_v51 }
 0x13d   : > { %1113 = vset.pattern.permute.xlu1 %v1200_v17 }
 0x13e   : > { %789 = vperm.xlu1 %1113, %v1346_v15  }
 0x13f   : > { %v1660_v44 = vpop.permute.xlu2 %592  ;;  %v429_v54 = vpop.permute.xlu1 %428 }
 0x140   : > { %v434_v45 = vsel %vm432_vm3, %v423_v28, %v429_v54  ;;  %v437_v20 = vsel %vm432_vm3, %v429_v54, %v423_v28  ;;  %v658_v21 = vpop.permute.xlu0 %657  ;;  %vm882_vm3 = vcmask 195584  }
 0x141   : > { %v441_v15 = vsel %vm395_vm5, %v437_v20, 0.0  ;;  %v442_v17 = vsel %vm396_vm6, %v434_v45, 0.0 }
 0x142   : > { %v447_v25 = vsel %vm1544_vm7, %v441_v15, 0.0  ;;  %v448_v12 = vsel %vm1548_vm8, %v442_v17, 0.0 }
 0x143   : > { %v468_v26 = vmul.f32 %v1448_v58, %v447_v25  ;;  %v469_v56 = vmul.f32 %v1448_v58, %v448_v12  ;;  %v645_v12 = vmul.f32 %v1430_v55, %v1378_v37 }
 0x145   : > { %v474_v0 = vadd.f32 %v468_v26, %v1364_v22  ;;  %v475_v27 = vadd.f32 %v469_v56, %v1364_v22  ;;  %v674_v56 = vsel %vm1590_vm10, %v1642_v2, 0.0 }
 0x146   : > { %814 = vrot.lane.b32.xlu1 %v1368_v30, %s1198_s21  ;;  %v548_v30 = vsel %vm395_vm5, %v1505_v16, 0.0  ;;  %s1134_s21 = sshra.s32 %s956_s20, 4  ;;  %s1135_s21 = int_to_ptr.hbm [resolvable:$true] %s1134_s21 }
 0x147   : > { %v1668_v23 = vpop.permute.xlu2 %708  ;;  %v481_v1 = vpop.permute.xlu1 %480  ;;  %1117 = vset.pattern.permute.xlu1 %v1199_v11  ;;  %v549_v11 = vsel %vm396_vm6, %v1501_v14, 0.0  ;;  %v554_v28 = vsel %vm1590_vm10, %v548_v30, 0.0  ;;  %v646_v30 = vmul.f32 %v1430_v55, %v1388_v41  ;;  %s1136_s22 = scalar_lea.hbm %s1135_s21, 8  ;;  %p1141_p0 = scmp.lt.s32.totalorder %s1135_s21, %s1967_s7 }
 0x148   : > { %v1675_v24 = vpop.permute.xlu0 %706  ;;  %v555_v14 = vsel %vm1594_vm11, %v549_v11, 0.0  ;;  %v572_v29 = vmul.f32 %v1406_v50, %v554_v28  ;;  %p1137_p11 = scmp.ne.s32.totalorder %s1135_s21, %s1136_s22  ;;  %p1142_p1 = scmp.lt.s32.totalorder %s1140_s8, %s1136_s22 }
 0x149   : > { %v573_v59 = vmul.f32 %v1406_v50, %v555_v14 }
 0x14a   : > { %p1138_p12 = pnand %p1137_p11, %p1279_p5  ;;  %p1143_p2 = por %p1142_p1, %p1141_p0 }
 0x14c   : > { %p1139_p13 = pneg %p1138_p12 }
 0x14e   : > { %840 = vperm.xlu1 %1117, %v1322_v10   ;;  %p1144_p3 = pnand %p1143_p2, %p1139_p13 }
 0x14f   : > { %v1690_v63 = vpop.permute.xlu2 %769  ;;  %v487_v31 = vpop.permute.xlu1 %486 }
 0x150   : > { %v492_v40 = vsel %vm490_vm9, %v481_v1, %v487_v31  ;;  %v495_v32 = vsel %vm490_vm9, %v487_v31, %v481_v1  ;;  %v532_v16 = vpop.permute.xlu0 %531  ;;  %v675_v31 = vsel %vm1594_vm11, %v1646_v33, 0.0 }
 0x151   : > { %v499_v58 = vsel %vm395_vm5, %v495_v32, 0.0  ;;  %v500_v10 = vsel %vm396_vm6, %v492_v40, 0.0 }
 0x152   : > { %v517_v47 = vmul.f32 %v1458_v60, %v499_v58  ;;  %v518_v61 = vmul.f32 %v1458_v60, %v500_v10 }
 0x154   : > { %v523_v38 = vadd.f32 %v517_v47, %v474_v0  ;;  %v524_v49 = vadd.f32 %v518_v61, %v475_v27 }
 0x156   : > { %v578_v39 = vadd.f32 %v572_v29, %v523_v38  ;;  %v579_v34 = vadd.f32 %v573_v59, %v524_v49 }
 0x157   : > { %v1710_v51 = vpop.permute.xlu2 %710  ;;  %v585_v54 = vpop.permute.xlu1 %584 }
 0x158   : > { %v596_v45 = vsel %vm594_vm4, %v585_v54, %v1513_v18  ;;  %v599_v22 = vsel %vm594_vm4, %v1513_v18, %v585_v54  ;;  %v538_v60 = vpop.permute.xlu0 %537 }
 0x159   : > { %v603_v20 = vsel %vm1544_vm7, %v599_v22, 0.0  ;;  %v604_v50 = vsel %vm1548_vm8, %v596_v45, 0.0  ;;  %v545_v47 = vsel %vm539_vm2, %v538_v60, %v532_v16 }
 0x15a   : > { %v621_v1 = vmul.f32 %v1481_v4, %v603_v20  ;;  %v622_v15 = vmul.f32 %v1481_v4, %v604_v50 }
 0x15c   : > { %v627_v17 = vadd.f32 %v621_v1, %v578_v39  ;;  %v628_v25 = vadd.f32 %v622_v15, %v579_v34 }
 0x15e   : > { %v651_v18 = vadd.f32 %v645_v12, %v627_v17  ;;  %v652_v11 = vadd.f32 %v646_v30, %v628_v25  ;;  %v648_v25 = vmul.f32 %v1422_v53, %v1414_v52 }
 0x15f   : > { %v682_v26 = vpop.permute.xlu2 %681  ;;  %v664_v4 = vpop.permute.xlu1 %663 }
 0x160   : > { %v692_v40 = vmul.f32 %v682_v26, %v674_v56  ;;  %v693_v32 = vmul.f32 %v682_v26, %v675_v31  ;;  %v669_v37 = vsel %vm667_vm12, %v658_v21, %v664_v4  ;;  %v672_v41 = vsel %vm667_vm12, %v664_v4, %v658_v21  ;;  %v660_v55 = vpop.permute.xlu0 %659 }
 0x161   : > { %v676_v28 = vsel %vm1590_vm10, %v669_v37, 0.0  ;;  %v677_v2 = vsel %vm1594_vm11, %v672_v41, 0.0  ;;  %v542_v21 = vsel %vm539_vm2, %v532_v16, %v538_v60  ;;  %vm820_vm2 = vcmp.lt.s32.totalorder %v1488_v7, 111 }
 0x162   : > { %v1743_v14 = vadd.f32 %v692_v40, %v1654_v13  ;;  %v1746_v33 = vadd.f32 %v693_v32, %v1656_v19  ;;  %v694_v58 = vmul.f32 %v1466_v62, %v676_v28  ;;  %v695_v10 = vmul.f32 %v1466_v62, %v677_v2 }
 0x163   : > { %v550_v13 = vsel %vm395_vm5, %v545_v47, 0.0  ;;  %v551_v19 = vsel %vm396_vm6, %v542_v21, 0.0 }
 0x164   : > { %v700_v0 = vadd.f32 %v694_v58, %v651_v18  ;;  %v701_v27 = vadd.f32 %v695_v10, %v652_v11  ;;  %v556_v16 = vsel %vm1590_vm10, %v550_v13, 0.0  ;;  %v557_v38 = vsel %vm1594_vm11, %v551_v19, 0.0 }
 0x165   : > { %v574_v49 = vmul.f32 %v1479_v3, %v556_v16  ;;  %v575_v39 = vmul.f32 %v1479_v3, %v557_v38 }
 0x167   : > { %v713_v61 = vpop.permute.xlu1 %712  ;;  %v580_v20 = vadd.f32 %v574_v49, %v1650_v5  ;;  %v581_v3 = vadd.f32 %v575_v39, %v1652_v6  ;;  %v1789_v12 = vpop.permute.xlu2 %767 }
 0x168   : > { %v718_v62 = vsel %vm716_vm13, %v1675_v24, %v713_v61  ;;  %v721_v29 = vsel %vm716_vm13, %v713_v61, %v1675_v24  ;;  %v715_v59 = vpop.permute.xlu0 %714 }
 0x169   : > { %v726_v6 = vsel %vm398_vm15, %v721_v29, 0.0  ;;  %v719_v10 = vsel %vm716_vm13, %v1668_v23, %v715_v59  ;;  %v722_v21 = vsel %vm716_vm13, %v715_v59, %v1668_v23 }
 0x16a   : > { %v727_v47 = vsel %vm397_vm14, %v719_v10, 0.0  ;;  %v728_v61 = vsel %vm398_vm15, %v722_v21, 0.0 }
 0x16b   : > { %v734_v59 = vsel %vm1548_vm8, %v728_v61, 0.0 }
 0x16f   : > { %v587_v34 = vpop.permute.xlu1 %586  ;;  %v1797_v26 = vpop.permute.xlu2 %816 }
 0x170   : > { %v597_v54 = vsel %vm594_vm4, %v587_v34, %v1660_v44  ;;  %v600_v24 = vsel %vm594_vm4, %v1660_v44, %v587_v34  ;;  %v745_v45 = vpop.permute.xlu0 %744  ;;  %v647_v44 = vmul.f32 %v1422_v53, %v1404_v48  ;;  %v732_v53 = vsel %vm1548_vm8, %v726_v6, 0.0 }
 0x171   : > { %v605_v22 = vsel %vm1544_vm7, %v600_v24, 0.0  ;;  %v606_v60 = vsel %vm1548_vm8, %v597_v54, 0.0  ;;  %v752_v39 = vmul.f32 %v745_v45, %v734_v59 }
 0x172   : > { %v623_v50 = vmul.f32 %v1496_v8, %v605_v22  ;;  %v624_v1 = vmul.f32 %v1496_v8, %v606_v60  ;;  %v725_v8 = vsel %vm397_vm14, %v718_v62, 0.0 }
 0x173   : > { %v731_v52 = vsel %vm1544_vm7, %v725_v8, 0.0 }
 0x174   : > { %v629_v15 = vadd.f32 %v623_v50, %v580_v20  ;;  %v630_v17 = vadd.f32 %v624_v1, %v581_v3 }
 0x176   : > { %v653_v30 = vadd.f32 %v647_v44, %v629_v15  ;;  %v654_v18 = vadd.f32 %v648_v25, %v630_v17 }
 0x177   : > { %v666_v11 = vpop.permute.xlu1 %665 }
 0x178   : > { %v813_v5 = vpop.permute.xlu0 %812  ;;  %v670_v40 = vsel %vm667_vm12, %v660_v55, %v666_v11  ;;  %v673_v32 = vsel %vm667_vm12, %v666_v11, %v660_v55 }
 0x179   : > { %v678_v28 = vsel %vm1590_vm10, %v670_v40, 0.0  ;;  %v679_v2 = vsel %vm1594_vm11, %v673_v32, 0.0 }
 0x17a   : > { %v696_v55 = vmul.f32 %v1440_v57, %v678_v28 }
 0x17c   : > { %v702_v62 = vadd.f32 %v696_v55, %v653_v30 }
 0x17f   : > { %v764_v48 = vpop.permute.xlu1 %763 }
 0x180   : > { %v741_v56 = vpop.permute.xlu0 %740  ;;  %v774_v13 = vsel %vm771_vm1, %v764_v48, %v1690_v63  ;;  %v777_v23 = vsel %vm771_vm1, %v1690_v63, %v764_v48 }
 0x181   : > { %v749_v31 = vmul.f32 %v741_v56, %v731_v52  ;;  %v750_v4 = vmul.f32 %v741_v56, %v732_v53  ;;  %v782_v16 = vsel %vm397_vm14, %v774_v13, 0.0  ;;  %v783_v38 = vsel %vm398_vm15, %v777_v23, 0.0 }
 0x183   : > { %v1807_v37 = vadd.f32 %v749_v31, %v700_v0  ;;  %v1809_v41 = vadd.f32 %v750_v4, %v701_v27  ;;  %v697_v0 = vmul.f32 %v1440_v57, %v679_v2  ;;  %v1824_v27 = vpop.permute.xlu2 %759  ;;  %v733_v57 = vsel %vm1544_vm7, %v727_v47, 0.0 }
 0x184   : > { %v751_v49 = vmul.f32 %v745_v45, %v733_v57 }
 0x185   : > { %v703_v29 = vadd.f32 %v697_v0, %v654_v18 }
 0x186   : > { %v757_v3 = vadd.f32 %v751_v49, %v702_v62 }
 0x187   : > { %v705_v58 = vpop.permute.xlu1 %704  ;;  %v758_v50 = vadd.f32 %v752_v39, %v703_v29 }
 0x188   : > { %v717_v31 = vsel %vm716_vm13, %v705_v58, %v1710_v51  ;;  %v720_v4 = vsel %vm716_vm13, %v1710_v51, %v705_v58 }
 0x189   : > { %v794_v19 = vpop.permute.xlu0 %793  ;;  %v723_v40 = vsel %vm397_vm14, %v717_v31, 0.0  ;;  %v724_v32 = vsel %vm398_vm15, %v720_v4, 0.0 }
 0x18a   : > { %v800_v63 = vmul.f32 %v794_v19, %v782_v16  ;;  %v801_v34 = vmul.f32 %v794_v19, %v783_v38  ;;  %v729_v28 = vsel %vm1544_vm7, %v723_v40, 0.0  ;;  %v730_v2 = vsel %vm1548_vm8, %v724_v32, 0.0  ;;  %v928_v40 = vld.sshfl [vmem:[#allocation1 + $0x8] sm:$0xff pattern:$0x75316420] }
 0x18b   : > { %v849_v1 = vpop.permute.xlu2 %848 }
 0x18c   : > { %v806_v17 = vadd.f32 %v800_v63, %v757_v3  ;;  %v807_v25 = vadd.f32 %v801_v34, %v758_v50 }
 0x18f   : > { %v819_v54 = vpop.permute.xlu1 %818 }
 0x190   : > { %v823_v24 = vsel %vm820_vm2, %v813_v5, %v819_v54  ;;  %v826_v22 = vsel %vm820_vm2, %v819_v54, %v813_v5 }
 0x191   : > { %v831_v60 = vsel %vm397_vm14, %v823_v24, 0.0  ;;  %v832_v20 = vsel %vm398_vm15, %v826_v22, 0.0  ;;  %v766_v53 = vpop.permute.xlu0 %765 }
 0x192   : > { %v837_v45 = vsel %vm1590_vm10, %v831_v60, 0.0  ;;  %v838_v15 = vsel %vm1594_vm11, %v832_v20, 0.0  ;;  %v772_v60 = vsel %vm771_vm1, %v1824_v27, %v766_v53  ;;  %v775_v20 = vsel %vm771_vm1, %v766_v53, %v1824_v27 }
 0x193   : > { %v855_v44 = vmul.f32 %v849_v1, %v837_v45  ;;  %v856_v30 = vmul.f32 %v849_v1, %v838_v15  ;;  %v786_v1 = vpop.permute.xlu2 %785  ;;  %v778_v45 = vsel %vm397_vm14, %v772_v60, 0.0  ;;  %v779_v15 = vsel %vm398_vm15, %v775_v20, 0.0 }
 0x195   : > { %v861_v18 = vadd.f32 %v855_v44, %v806_v17  ;;  %v862_v11 = vadd.f32 %v856_v30, %v807_v25  ;;  %v796_v44 = vmul.f32 %v786_v1, %v778_v45  ;;  %v797_v25 = vmul.f32 %v786_v1, %v779_v15 }
 0x197   : > { %v762_v5 = vpop.permute.xlu1 %761  ;;  %v867_v8 = vmax.f32 %v861_v18, 0.0  ;;  %v868_v6 = vmax.f32 %v862_v11, 0.0 }
 0x198   : > { %v773_v61 = vsel %vm771_vm1, %v762_v5, %v1789_v12  ;;  %v776_v13 = vsel %vm771_vm1, %v1789_v12, %v762_v5 }
 0x199   : > { %v873_v48 = vmin.f32 %v867_v8, 6.0  ;;  %v874_v52 = vmin.f32 %v868_v6, 6.0  ;;  %v809_v21 = vpop.permute.xlu0 %808  ;;  %v780_v62 = vsel %vm397_vm14, %v773_v61, 0.0  ;;  %v781_v29 = vsel %vm398_vm15, %v776_v13, 0.0 }
 0x19b   : > { %899 = vmatpush.msra.mxu2 %v873_v48  ;;  %919 = vmatpush.msra.mxu3 %v874_v52  ;;  %v880_v9 = vpop.permute.xlu2 %879 }
 0x19f   : > { %v811_v56 = vpop.permute.xlu1 %810 }
 0x1a0   : > { %v822_v51 = vsel %vm820_vm2, %v811_v56, %v1797_v26  ;;  %v825_v58 = vsel %vm820_vm2, %v1797_v26, %v811_v56 }
 0x1a1   : > { %v829_v26 = vsel %vm397_vm14, %v822_v51, 0.0  ;;  %v845_v19 = vpop.permute.xlu0 %844 }
 0x1a7   : > { %v737_v10 = vpop.permute.xlu1 %736 }
 0x1a8   : > { %v747_v55 = vmul.f32 %v737_v10, %v729_v28  ;;  %v748_v0 = vmul.f32 %v737_v10, %v730_v2  ;;  %v927_v2 = vld.sshfl [vmem:[#allocation1] sm:$0xff pattern:$0x75316420] }
 0x1aa   : > { %v753_v47 = vadd.f32 %v747_v55, %v1743_v14  ;;  %v754_v42 = vadd.f32 %v748_v0, %v1746_v33  ;;  %v830_v14 = vsel %vm398_vm15, %v825_v58, 0.0  ;;  %v835_v33 = vsel %vm1590_vm10, %v829_v26, 0.0 }
 0x1ab   : > { %v836_v23 = vsel %vm1594_vm11, %v830_v14, 0.0  ;;  %v853_v16 = vmul.f32 %v845_v19, %v835_v33 }
 0x1ac   : > { %v854_v38 = vmul.f32 %v845_v19, %v836_v23  ;;  %v802_v8 = vadd.f32 %v796_v44, %v753_v47  ;;  %v803_v6 = vadd.f32 %v797_v25, %v754_v42 }
 0x1b0   : > { %v790_v12 = vpop.permute.xlu1 %789 }
 0x1b1   : > { %v798_v57 = vmul.f32 %v790_v12, %v780_v62  ;;  %v799_v59 = vmul.f32 %v790_v12, %v781_v29 }
 0x1b3   : > { %v804_v49 = vadd.f32 %v798_v57, %v1807_v37  ;;  %v805_v39 = vadd.f32 %v799_v59, %v1809_v41 }
 0x1b5   : > { %v859_v63 = vadd.f32 %v853_v16, %v804_v49  ;;  %v860_v34 = vadd.f32 %v854_v38, %v805_v39 }
 0x1b7   : > { %v865_v54 = vmax.f32 %v859_v63, 0.0  ;;  %v866_v24 = vmax.f32 %v860_v34, 0.0 }
 0x1b8   : > { %v815_v22 = vpop.permute.xlu1 %814 }
 0x1b9   : > { %v871_v3 = vmin.f32 %v865_v54, 6.0  ;;  %v872_v50 = vmin.f32 %v866_v24, 6.0  ;;  %v821_v37 = vsel %vm820_vm2, %v809_v21, %v815_v22  ;;  %v824_v41 = vsel %vm820_vm2, %v815_v22, %v809_v21 }
 0x1ba   : > { %v827_v27 = vsel %vm397_vm14, %v821_v37, 0.0  ;;  %v828_v17 = vsel %vm398_vm15, %v824_v41, 0.0 }
 0x1bb   : > { %900 = vmatpush.msra.mxu2 %v871_v3  ;;  %920 = vmatpush.msra.mxu3 %v872_v50  ;;  %v833_v7 = vsel %vm1590_vm10, %v827_v27, 0.0  ;;  %v834_v18 = vsel %vm1594_vm11, %v828_v17, 0.0 }
 0x1c0   : > { %v841_v30 = vpop.permute.xlu1 %840 }
 0x1c1   : > { %v851_v11 = vmul.f32 %v841_v30, %v833_v7  ;;  %v852_v5 = vmul.f32 %v841_v30, %v834_v18 }
 0x1c3   : > { %v857_v35 = vadd.f32 %v851_v11, %v802_v8  ;;  %v858_v48 = vadd.f32 %v852_v5, %v803_v6 }
 0x1c5   : > { %v863_v52 = vmax.f32 %v857_v35, 0.0  ;;  %v864_v36 = vmax.f32 %v858_v48, 0.0 }
 0x1c7   : > { %v869_v53 = vmin.f32 %v863_v52, 6.0  ;;  %v870_v56 = vmin.f32 %v864_v36, 6.0 }
 0x1c9   : > { %901 = vmatpush.msra.mxu2 %v869_v53  ;;  %921 = vmatpush.msra.mxu3 %v870_v56 }
 0x1ca   : > { %1030 = vmatmul.msk.f32.vlgmr.msra.gmra.mxu2 %vm882_vm3, %v875_v46  ;;  %1031 = vmatmul.msk.f32.vlgmr.msra.gmra.mxu3 %vm882_vm3, %v875_v46 }
 0x24d   : > { %v903_v31 = vpop.f32.mrf.mxu2  ;;  %v923_v4 = vpop.f32.mrf.mxu3 }
 0x24e   : > { %v904_v32 = vadd.f32 %v903_v31, %v880_v9  ;;  %v924_v28 = vadd.f32 %v923_v4, %v880_v9 }
 0x250   : > { %v932_v10 = vadd.f32 %v928_v40, %v924_v28  ;;  %v931_v21 = vadd.f32 %v927_v2, %v904_v32 }
 0x252   : > { %v935_v55 = vrot.slane %v932_v10, 4 }
 0x254   : > { %v936_v0 = vsel %vm313_vm0, %v931_v21, %v935_v55 }
 0x255   : > { %938 = vst [vmem:[%s271_s18] sm:$0xff] %v936_v0 }
 0x256   : > { %1147 = shalt.err (!%p1144_p3)
}
 0x257   : > { %1039 = dma.vmem_to_hbm [thread:$0]  (%p1279_p5), %s954_s19, 128, %s956_s20, %s940_s28  }
 0x258 PF: > { %p1045_p4 = scmp.ge.s32.totalorder %s1182_s27, 2  ;;  %s967_s9 = sand.u32 1, %s1170_s24  }
 0x259   : > { %s968_s15 = scalar_lea.sflag [#allocation3], %s967_s9 }
 0x25a   : > { %p1042_p7 = pnand %p1045_p4, %p1283_p6 }
 0x25c   : > { %p1043_p8 = pneg %p1042_p7 }
 0x25e   : > { %1165 = dma.done.wait (%p1043_p8), %s968_s15, 128  }
 0x25f   : > { %1167 = vsyncadd (%p1043_p8), %s968_s15, 4294967168  ;;  %p17_p9 = scmp.ge.s32.totalorder %s1266_s30, 4   ;;  %s1978_s24 = smov %s1174_s25 }
 0x260   : > { %s1979_s25 = smov %s1178_s26  ;;  %s1980_s26 = smov %s1277_s10 }
 0x261   : > { %s1981_s27 = smov %s1266_s30  ;;  %19 = sbr.rel (!%p17_p9) target bundleno = 3 (0x3), region = 83 }
 0x266   :  { %974 = vsyncpa [#allocation3], 1 }
 0x267   :  { %976 = vsyncpa [#allocation3 + $0x1], 1 }

</bundles_post_ra>
